<compile_context>
chip_gen: v7x
topology: tpu7x:2x2x1
jax: 0.10.0
libtpu: 0.0.40
codegen_flags: <defaults>
</compile_context>

<pallas_src>
import jax
import jax.numpy as jnp
from jax.experimental import pallas as pl
from jax.experimental.pallas import tpu as pltpu

_TQ_MAX = 8192                           # query-tile cap (amortize grid-step overhead)
_VMEM_BUDGET_BYTES = 40 * 1024 * 1024    # tile-sizing budget (fits v7x's 64 MiB VMEM)
_VMEM_LIMIT_CAP = 48 * 1024 * 1024       # scoped-VMEM ceiling (v7x-safe)


def _round_up(x, m):
    return -(-x // m) * m


def _global_attn_kernel(src_ref, tgt_ref, wc_ref, attn_ref):
    # src_ref : (bt, idf, sourceL)  precomputed conv1x1(context); resident over q tiles
    # tgt_ref : (bt, idf, TQ)       query tile (queryL lane-dense)
    # wc_ref  : (bt, idf, TQ)
    # attn_ref: (bt, sourceL, TQ)
    src = src_ref[...].astype(jnp.float32)                             # (bt, idf, sourceL)
    tgt = tgt_ref[...].astype(jnp.float32)                             # (bt, idf, TQ)

    # scores[b, s, q] = sum_i src[b, i, s] * tgt[b, i, q]  -- contract idf; the
    # result is already in the final (sourceL, queryL) layout, no transpose.
    scores = jnp.einsum('bis,biq->bsq', src, tgt,
                        preferred_element_type=jnp.float32)            # (bt, sourceL, TQ)

    # Softmax over sourceL (sublane axis): cheap reductions, queryL stays on lanes.
    # TODO(synk): applyMask() path (masked_fill with -inf over padded caption
    #             words) not implemented; the module's default has self.mask = None.
    m = jnp.max(scores, axis=1, keepdims=True)                         # (bt, 1, TQ)
    e = jnp.exp(scores - m)                                            # (bt, sourceL, TQ)
    s = jnp.sum(e, axis=1, keepdims=True)                              # (bt, 1, TQ)
    # Exact reciprocal keeps parity with the reference softmax; s is only
    # (bt, 1, TQ) so this is cheap (flip to approx=True if tolerance allows).
    p = e * pl.reciprocal(s, approx=False)                             # (bt, sourceL, TQ)

    # weightedContext[b, i, q] = sum_s src[b, i, s] * p[b, s, q]
    wc = jnp.einsum('bis,bsq->biq', src, p,
                    preferred_element_type=jnp.float32)                # (bt, idf, TQ)

    wc_ref[...] = wc.astype(wc_ref.dtype)
    attn_ref[...] = p.astype(attn_ref.dtype)


def _choose_tiling(B, idf, sourceL, queryL, in_itemsize, wc_itemsize, attn_itemsize,
                   tq=None, bt=None, vmem_budget_bytes=_VMEM_BUDGET_BYTES):
    """Pick (bt, tq, q_pad) so tiles are large (kernel is HBM-bound), fit VMEM,
    queryL stays a 128-multiple (unmasked lane-dense stores), and there are
    >=4 grid steps when possible (v7x megacore + double-buffered pipeline)."""
    q128 = _round_up(queryL, 128)
    sL8 = _round_up(sourceL, 8)

    # Per query column, per batch row: double-buffered {target, wc, attn} blocks
    # plus ~3 f32 (sourceL, tq) softmax temporaries, plus slack for f32 widening.
    per_q = (2 * idf * in_itemsize
             + 2 * idf * wc_itemsize
             + 2 * sL8 * attn_itemsize
             + 3 * sL8 * 4
             + idf * 4)

    auto_tq = tq is None
    if auto_tq:
        tq_cap = min(_TQ_MAX, max(128, (vmem_budget_bytes // per_q) // 128 * 128))
        if q128 <= tq_cap:
            tq = q128
        else:
            n_tiles = -(-q128 // tq_cap)
            tq = _round_up(-(-q128 // n_tiles), 128)
    else:
        assert tq == queryL or tq % 128 == 0, \
            "tq must equal queryL or be a multiple of 128"

    q_pad = _round_up(queryL, tq) if tq % 128 == 0 else queryL
    num_q_tiles = q_pad // tq

    auto_bt = bt is None
    if auto_bt:
        bt = 1
        # Batch folding: when queryL is small and B is large, fold several
        # batches into one block so each step amortizes grid/DMA-issue overhead.
        step_bytes = tq * per_q
        if num_q_tiles == 1 and B >= 8 and step_bytes * 4 <= vmem_budget_bytes:
            bt = max(1, min(B // 4, (vmem_budget_bytes // 4) // max(step_bytes, 1)))
            while bt > 1 and B % bt != 0:
                bt -= 1
    else:
        assert B % bt == 0, "bt must divide B"

    if auto_tq and bt == 1:
        # Keep >=4 total grid steps (>=2 per TensorCore on v7x) when we can
        # still split the query tile into 128-multiples.
        while B * num_q_tiles < 4 and tq % 256 == 0:
            tq //= 2
            num_q_tiles *= 2

    return bt, tq, q_pad, B // bt, num_q_tiles


def global_attention_general(inp, context, weight, *, tq=None, bt=None,
                             wc_dtype=None, attn_dtype=None):
    """inp: (B, idf, ih, iw), context: (B, cdf, sourceL), weight: (idf, cdf).

    Returns (weightedContext (B, idf, ih, iw), attn (B, sourceL, ih, iw)),
    matching GlobalAttentionGeneral.forward with mask=None.
    """
    B, idf, ih, iw = inp.shape
    _, cdf, sourceL = context.shape
    queryL = ih * iw

    wc_dtype = inp.dtype if wc_dtype is None else jnp.dtype(wc_dtype)
    attn_dtype = inp.dtype if attn_dtype is None else jnp.dtype(attn_dtype)

    # conv1x1(cdf->idf, bias=False) on context == W @ context. Tiny
    # (B*idf*sourceL elements) -> compute once here, not per grid step.
    sourceT = jnp.einsum('ic,bcs->bis', weight, context,
                         preferred_element_type=jnp.float32)           # (B, idf, sourceL) f32

    # View-only reshape; NO transpose materialized in HBM — queryL stays the
    # fast (lane) axis end to end.
    target = inp.reshape(B, idf, queryL)

    in_itemsize = jnp.dtype(inp.dtype).itemsize
    bt, tq, q_pad, num_b_tiles, num_q_tiles = _choose_tiling(
        B, idf, sourceL, queryL, in_itemsize,
        jnp.dtype(wc_dtype).itemsize, jnp.dtype(attn_dtype).itemsize, tq=tq, bt=bt)

    if q_pad != queryL:
        # Pad queryL so output stores stay unmasked full-width and the softmax
        # never sees garbage lanes (zero columns -> finite uniform softmax,
        # sliced off below).
        target = jnp.pad(target, ((0, 0), (0, 0), (0, q_pad - queryL)))

    sL8 = _round_up(sourceL, 8)
    block_bytes = bt * tq * (2 * idf * in_itemsize
                             + 2 * idf * jnp.dtype(wc_dtype).itemsize
                             + 2 * sL8 * jnp.dtype(attn_dtype).itemsize
                             + 3 * sL8 * 4) \
        + 2 * bt * idf * sL8 * 4
    vmem_limit = int(min(max(2 * block_bytes, 16 * 1024 * 1024), _VMEM_LIMIT_CAP))

    cost = pl.CostEstimate(
        flops=4 * B * q_pad * idf * sourceL,      # scores + weightedContext matmuls
        transcendentals=B * q_pad * sourceL,      # exp
        bytes_accessed=(sourceT.size * 4
                        + target.size * in_itemsize
                        + B * idf * q_pad * jnp.dtype(wc_dtype).itemsize
                        + B * sourceL * q_pad * jnp.dtype(attn_dtype).itemsize),
    )

    wc_flat, attn_t = pl.pallas_call(
        _global_attn_kernel,
        out_shape=(
            jax.ShapeDtypeStruct((B, idf, q_pad), wc_dtype),
            jax.ShapeDtypeStruct((B, sourceL, q_pad), attn_dtype),
        ),
        grid_spec=pltpu.PrefetchScalarGridSpec(
            num_scalar_prefetch=0,
            grid=(num_b_tiles, num_q_tiles),
            in_specs=[
                # sourceT: index_map constant over q -> resident across query tiles.
                pl.BlockSpec((bt, idf, sourceL), lambda b, q: (b, 0, 0)),
                pl.BlockSpec((bt, idf, tq), lambda b, q: (b, 0, q)),
            ],
            out_specs=[
                pl.BlockSpec((bt, idf, tq), lambda b, q: (b, 0, q)),
                pl.BlockSpec((bt, sourceL, tq), lambda b, q: (b, 0, q)),
            ],
        ),
        compiler_params=pltpu.CompilerParams(
            # Both axes independent -> megacore sharding on v7x, harmless on v5e/v6e.
            dimension_semantics=("parallel", "parallel"),
            vmem_limit_bytes=vmem_limit,
        ),
        cost_estimate=cost,
    )(sourceT, target)

    if q_pad != queryL:
        wc_flat = wc_flat[:, :, :queryL]
        attn_t = attn_t[:, :, :queryL]
    weightedContext = wc_flat.reshape(B, idf, ih, iw)
    attn = attn_t.reshape(B, sourceL, ih, iw)
    return weightedContext, attn


def _reference(inp, context, weight):
    B, idf, ih, iw = inp.shape
    _, cdf, sourceL = context.shape
    queryL = ih * iw
    target = inp.reshape(B, idf, queryL)
    targetT = jnp.transpose(target, (0, 2, 1))
    sourceT = jnp.einsum("ic,bcs->bis", weight, context)
    attn = jnp.einsum("bqi,bis->bqs", targetT, sourceT)
    attn = jax.nn.softmax(attn, axis=-1)
    attnT = jnp.transpose(attn, (0, 2, 1))
    wc = jnp.einsum("bis,bsq->biq", sourceT, attnT)
    return wc.reshape(B, idf, ih, iw), attnT.reshape(B, sourceL, ih, iw)


if __name__ == "__main__":
    key = jax.random.PRNGKey(0)

    def _make(key, B, idf, cdf, ih, iw, sourceL, dtype=jnp.float32):
        k1, k2, k3 = jax.random.split(key, 3)
        inp = jax.random.normal(k1, (B, idf, ih, iw), dtype=dtype)
        context = jax.random.normal(k2, (B, cdf, sourceL), dtype=dtype)
        # conv1x1 weight (idf, cdf, 1, 1) squeezed to (idf, cdf).
        weight = jax.random.normal(k3, (idf, cdf), dtype=dtype) * 0.1
        return inp, context, weight

    run = jax.jit(global_attention_general)

    cases = [
        # (B, idf, cdf, ih, iw, sourceL)
        (2, 32, 16, 16, 16, 8),   # queryL=256: auto-split into >=4 grid steps
        (2, 16, 8, 10, 10, 6),    # queryL=100: exercises 128-padding of queryL
        (8, 16, 8, 8, 8, 8),      # small queryL, larger B: exercises batch folding
    ]
    for i, (B, idf, cdf, ih, iw, sourceL) in enumerate(cases):
        key, sub = jax.random.split(key)
        inp, context, weight = _make(sub, B, idf, cdf, ih, iw, sourceL)
        wc, attn = run(inp, context, weight)
        jax.block_until_ready((wc, attn))

        wc_ref, attn_ref = _reference(inp, context, weight)
        assert wc.shape == wc_ref.shape and attn.shape == attn_ref.shape
        assert jnp.allclose(wc, wc_ref, atol=1e-4, rtol=1e-4), \
            f"weightedContext mismatch (case {i})"
        assert jnp.allclose(attn, attn_ref, atol=1e-5, rtol=1e-5), \
            f"attn mismatch (case {i})"

    print("KERNEL_OK")
</pallas_src>

<mosaic_0001>
module attributes {stable_mosaic.version = 11 : i64} {
  func.func @_global_attn_kernel(%arg0: i32, %arg1: i32, %arg2: memref<1x32x8xf32, #tpu.memory_space<vmem>>, %arg3: memref<1x32x128xf32, #tpu.memory_space<vmem>>, %arg4: memref<1x32x128xf32, #tpu.memory_space<vmem>>, %arg5: memref<1x8x128xf32, #tpu.memory_space<vmem>>) attributes {dimension_semantics = [#tpu.dimension_semantics<parallel>, #tpu.dimension_semantics<parallel>], iteration_bounds = array<i64: 2, 2>, scalar_prefetch = 0 : i64, scratch_operands = 0 : i64, tpu.core_type = #tpu.core_type<tc>, window_params = [{transform_indices = @transform_0, window_bounds = array<i64: 1, 32, 8>}, {transform_indices = @transform_1, window_bounds = array<i64: 1, 32, 128>}, {transform_indices = @transform_2, window_bounds = array<i64: 1, 32, 128>}, {transform_indices = @transform_3, window_bounds = array<i64: 1, 8, 128>}]} {
    %c0 = arith.constant 0 : index
    %c0_0 = arith.constant 0 : index
    %c0_1 = arith.constant 0 : index
    %0 = vector.load %arg2[%c0, %c0_0, %c0_1] : memref<1x32x8xf32, #tpu.memory_space<vmem>>, vector<1x32x8xf32>
    %c0_2 = arith.constant 0 : index
    %c0_3 = arith.constant 0 : index
    %c0_4 = arith.constant 0 : index
    %1 = vector.load %arg3[%c0_2, %c0_3, %c0_4] : memref<1x32x128xf32, #tpu.memory_space<vmem>>, vector<1x32x128xf32>
    "tpu.trace_start"() <{level = 10 : i32, message = "bis,biq->bsq"}> : () -> ()
    %cst = arith.constant dense<0.000000e+00> : vector<1x8x128xf32>
    %2 = tpu.matmul %0, %1, %cst {dimension_numbers = #tpu.dot_dimension_numbers<[1], [1], [2], [2], [0, 0, 0, 2, 1, 2], [0], [0]>} : vector<1x32x8xf32>, vector<1x32x128xf32>, vector<1x8x128xf32> -> vector<1x8x128xf32>
    "tpu.trace_stop"() : () -> ()
    %cst_5 = arith.constant dense<0xFF800000> : vector<1x128xf32>
    %3 = vector.multi_reduction <maximumf>, %2, %cst_5 [1] : vector<1x8x128xf32> to vector<1x128xf32>
    %4 = vector.shape_cast %3 : vector<1x128xf32> to vector<1x1x128xf32>
    %5 = vector.broadcast %4 : vector<1x1x128xf32> to vector<1x8x128xf32>
    %6 = arith.subf %2, %5 : vector<1x8x128xf32>
    %7 = math.exp %6 : vector<1x8x128xf32>
    %cst_6 = arith.constant dense<0.000000e+00> : vector<1x128xf32>
    %8 = vector.multi_reduction <add>, %7, %cst_6 [1] : vector<1x8x128xf32> to vector<1x128xf32>
    %9 = vector.shape_cast %8 : vector<1x128xf32> to vector<1x1x128xf32>
    %10 = tpu.reciprocal %9 : vector<1x1x128xf32> -> vector<1x1x128xf32>
    %11 = vector.broadcast %10 : vector<1x1x128xf32> to vector<1x8x128xf32>
    %12 = arith.mulf %7, %11 : vector<1x8x128xf32>
    "tpu.trace_start"() <{level = 10 : i32, message = "bis,bsq->biq"}> : () -> ()
    %cst_7 = arith.constant dense<0.000000e+00> : vector<1x32x128xf32>
    %13 = tpu.matmul %0, %12, %cst_7 {dimension_numbers = #tpu.dot_dimension_numbers<[2], [1], [1], [2], [0, 0, 0, 1, 1, 2], [0], [0]>} : vector<1x32x8xf32>, vector<1x8x128xf32>, vector<1x32x128xf32> -> vector<1x32x128xf32>
    "tpu.trace_stop"() : () -> ()
    %c0_8 = arith.constant 0 : index
    %c0_9 = arith.constant 0 : index
    %c0_10 = arith.constant 0 : index
    %14 = vector.load %arg4[%c0_8, %c0_9, %c0_10] : memref<1x32x128xf32, #tpu.memory_space<vmem>>, vector<1x32x128xf32>
    tpu.vector_store %arg4[%c0_8, %c0_9, %c0_10], %13 {strides = array<i32>} : memref<1x32x128xf32, #tpu.memory_space<vmem>>, vector<1x32x128xf32>,
    %c0_11 = arith.constant 0 : index
    %c0_12 = arith.constant 0 : index
    %c0_13 = arith.constant 0 : index
    %15 = vector.load %arg5[%c0_11, %c0_12, %c0_13] : memref<1x8x128xf32, #tpu.memory_space<vmem>>, vector<1x8x128xf32>
    tpu.vector_store %arg5[%c0_11, %c0_12, %c0_13], %12 {strides = array<i32>} : memref<1x8x128xf32, #tpu.memory_space<vmem>>, vector<1x8x128xf32>,
    return
  }
  func.func @transform_0(%arg0: i32, %arg1: i32) -> (i32, i32, i32) {
    %c0_i32 = arith.constant 0 : i32
    %c0_i32_0 = arith.constant 0 : i32
    %c0_i32_1 = arith.constant 0 : i32
    return %arg0, %c0_i32, %c0_i32_0 : i32, i32, i32
  }
  func.func @transform_1(%arg0: i32, %arg1: i32) -> (i32, i32, i32) {
    %c0_i32 = arith.constant 0 : i32
    %c0_i32_0 = arith.constant 0 : i32
    return %arg0, %c0_i32, %arg1 : i32, i32, i32
  }
  func.func @transform_2(%arg0: i32, %arg1: i32) -> (i32, i32, i32) {
    %c0_i32 = arith.constant 0 : i32
    %c0_i32_0 = arith.constant 0 : i32
    return %arg0, %c0_i32, %arg1 : i32, i32, i32
  }
  func.func @transform_3(%arg0: i32, %arg1: i32) -> (i32, i32, i32) {
    %c0_i32 = arith.constant 0 : i32
    %c0_i32_0 = arith.constant 0 : i32
    return %arg0, %c0_i32, %arg1 : i32, i32, i32
  }
}

</mosaic_0001>

<bundles_post_ra>
// kernel: global_attention_general.1
= control target key start
LH: loop header
LB: loop body
LE: loop exit
PB: predicated region body
PF: predicated region fallthrough
CT: control target
= control target key end

     0   :  { %s892_s12 = smov 0   ;;  %s894_s13 = smov 0   ;;  %s1010_s0 = inlined_call_operand.vmem [shape: f32[2,32,8], index: 0, kind: input, shape index: {}]   ;;  %s1011_s1 = inlined_call_operand.vmem [shape: f32[2,32,256], index: 1, kind: input, shape index: {}]   ;;  %s1012_s2 = inlined_call_operand.vmem [shape: f32[2,32,256], index: 2, kind: output, shape index: {0}]   ;;  %s1013_s3 = inlined_call_operand.vmem [shape: f32[2,8,256], index: 3, kind: output, shape index: {1}]  }
   0x1   :  { %s896_s14 = smov 0   ;;  %s898_s15 = smov 0  }
   0x2   :  { %s900_s16 = smov 0   ;;  %s902_s17 = smov 0  }
   0x3   :  { %s904_s18 = smov 0  }
   0x4 LB: > { %s23_s19 = sadd.s32 1, %s859_s16  ;;  %s26_s20 = sadd.s32 1, %s863_s17  ;;  %s867_s18 = sphi %s904_s18, %s14_s18   ;;  %s863_s17 = sphi %s902_s17, %s1020_s17   ;;  %s859_s16 = sphi %s900_s16, %s1019_s16   ;;  %s855_s15 = sphi %s898_s15, %s1018_s15   ;;  %s851_s14 = sphi %s896_s14, %s1017_s14   ;;  %s847_s13 = sphi %s894_s13, %s1016_s13   ;;  %s843_s12 = sphi %s892_s12, %s1015_s12  }
   0x5   : > { %p24_p0 = scmp.ge.s32.totalorder %s23_s19, 2  ;;  %s690_s21 = sadd.s32 4294967295, %s867_s18  }
   0x6   : > { %p68_p1 = scmp.ne.s32.totalorder %s847_s13, %s843_s12  ;;  %p69_p2 = scmp.eq.s32.totalorder %s867_s18, 0 }
   0x7   : > { %s1022_s19 = smov (%p24_p0, %s23_s19), 0  ;;  %s1024_s20 = smov (!%p24_p0, %s26_s20), %s863_s17 }
   0x8   : > { %p28_p3 = scmp.ge.s32.totalorder %s1024_s20, 2  ;;  %p100_p4 = scmp.eq.s32.totalorder %s690_s21, 3 }
   0x9   : > { %s57_s22 = ssub.s32 %s859_s16, %s1022_s19  ;;  %p70_p5 = por %p69_p2, %p68_p1 }
   0xa   : > { %s1026_s20 = smov (%p28_p3, %s1024_s20), 0  ;;  %p940_p6 = por %p100_p4, %p68_p1 }
   0xb   : > { %s56_s24 = ssub.s32 %s863_s17, %s1026_s20  ;;  %s61_s26 = sadd.s32 1, %s847_s13 }
   0xc   : > { %s58_s25 = sor.u32 %s57_s22, %s56_s24  ;;  %p693_p8 = scmp.ge.s32.totalorder %s867_s18, 4 }
   0xd   : > { %p59_p7 = scmp.eq.s32.totalorder %s58_s25, 0 }
   0xe   : > { %150 = sbr.rel (%p693_p8) target bundleno = 29 (0x1d), region = 16 }
   0xf   : > { %s948_s27 = scalar_select %p59_p7, %s847_s13, %s61_s26  }
  0x15   : > { %161 = sbr.rel (!%p70_p5) target bundleno = 29 (0x1d), region = 24  ;;  %s163_s28 = sand.u32 (%p70_p5), 1, %s847_s13  }
  0x16   : > { %s695_s29 = sshll.u32 (%p70_p5), %s863_s17, 3  ;;  %s694_s30 = sshll.u32 (%p70_p5), %s163_s28, 5 }
  0x17   : > { %s167_s4 = sadd.s32 (%p70_p5), %s859_s16, %s695_s29  ;;  %s165_s9 = scalar_lea.vmem (%p70_p5), [#allocation2], %s694_s30 }
  0x18   : > { %s696_s5 = sshll.u32 (%p70_p5), %s167_s4, 3 }
  0x19   : > { %s169_s8 = scalar_lea.vmem (%p70_p5), %s1011_s1, %s696_s5 }
  0x1a   : > { %v203_v0 = vld [vmem:[%s169_s8] sm:$0xff] (%p70_p5)  ;;  %v205_v1 = vld [vmem:[%s169_s8 + $0x10] sm:$0xff] (%p70_p5) }
  0x1b   : > { %v207_v2 = vld [vmem:[%s169_s8 + $0x20] sm:$0xff] (%p70_p5)  ;;  %204 = vst [vmem:[%s165_s9] sm:$0xff] (%p70_p5), %v203_v0  ;;  %206 = vst [vmem:[%s165_s9 + $0x8] sm:$0xff] (%p70_p5), %v205_v1  ;;  %v209_v3 = vld [vmem:[%s169_s8 + $0x30] sm:$0xff] (%p70_p5) }
  0x1c   : > { %208 = vst [vmem:[%s165_s9 + $0x10] sm:$0xff] %v207_v2  ;;  %210 = vst [vmem:[%s165_s9 + $0x18] sm:$0xff] %v209_v3 }
  0x1d PF: > { %p697_p9 = scmp.ge.s32.totalorder %s867_s18, 1  ;;  %p215_p10 = scmp.lt.s32.totalorder %s867_s18, 5 }
  0x1f   : > { %p216_p11 = pnand %p697_p9, %p215_p10 }
  0x20   : > { %p257_p12 = scmp.lt.s32.totalorder (!%p216_p11), %s855_s15, 1  ;;  %v869_v4 = vmov (!%p216_p11), 0.0|0.0   ;;  %vm870_vm0 = vmmov (!%p216_p11), 0   ;;  %v871_v5 = vmov (!%p216_p11), 0.0   ;;  %s222_s11 = sand.u32 (!%p216_p11), 1, %s843_s12   ;;  %vm310_vm1 = vcmask (!%p216_p11), 261120  }
  0x21   : > { %219 = sbr.rel (%p216_p11) target bundleno = 666 (0x29a), region = 62  ;;  %744 = vmatprep.subr.bf16.mxu0 (!%p216_p11), %v869_v4  ;;  %733 = vmatprep.mubr.msk.f32.mxu0 (!%p216_p11), %vm870_vm0, %v871_v5  ;;  %s968_s26 = sshll.u32 (!%p216_p11), %s222_s11, 5  ;;  %vm401_vm2 = vcmask (!%p216_p11), 64512  }
  0x22   : > { %s224_s28 = scalar_lea.vmem (!%p216_p11), [#allocation2], %s968_s26  ;;  %p264_p13 = scmp.lt.s32.totalorder (!%p216_p11), %s851_s14, 1 }
  0x23   : > { %v274_v8 = vld [vmem:[%s224_s28] sm:$0xff] (!%p216_p11)  ;;  %v275_v9 = vld [vmem:[%s224_s28 + $0x8] sm:$0xff] (!%p216_p11)  ;;  %v276_v10 = vld [vmem:[%s224_s28 + $0x10] sm:$0xff] (!%p216_p11)  ;;  %s246_s8 = scalar_lea.vmem (!%p216_p11), [#allocation3], %s968_s26 }
  0x24   : > { %v745_v11 = vpack.c.bf16 (!%p216_p11), %v275_v9, %v274_v8  ;;  %v277_v12 = vld [vmem:[%s224_s28 + $0x18] sm:$0xff] (!%p216_p11) }
  0x25   : > { %v748_v13 = vpack.c.bf16 (!%p216_p11), %v277_v12, %v276_v10 }
  0x26   : > { %746 = vmatpush3.bf16.msra.mxu0 (!%p216_p11), %v745_v11 }
  0x27   : > { %747 = vmatprep.subr.bf16.mxu0 (!%p216_p11), %v869_v4 }
  0x28   : > { %s961_s10 = scalar_select %p257_p12, %s855_s15, 1 }
  0x29   : > { %s265_s12 = scalar_select %p264_p13, %s851_s14, 1 }
  0x2a   : > { %s714_s21 = sshll.u32 %s961_s10, 5  ;;  %749 = vmatpush3.bf16.msra.mxu0 %v748_v13  ;;  %s702_s29 = sshll.u32 %s961_s10, 1 }
  0x2b   : > { %s261_s25 = scalar_lea.vmem %s1010_s0, %s714_s21  ;;  %s267_s30 = sadd.s32 %s702_s29, %s265_s12 }
  0x2c   : > { %v270_v6 = vld [vmem:[%s261_s25] sm:$0xff]  ;;  %v271_v7 = vld [vmem:[%s261_s25 + $0x8] sm:$0xff]  ;;  %v272_v14 = vld [vmem:[%s261_s25 + $0x10] sm:$0xff]  ;;  %s703_s4 = sshll.u32 %s267_s30, 3  ;;  %s710_s9 = sshll.u32 (%p940_p6), %s855_s15, 3 }
  0x2d   : > { %278 = vxpose.xlu0.b32.start [1/4] (short) (narrow) %v270_v6, 8  ;;  %v273_v15 = vld [vmem:[%s261_s25 + $0x18] sm:$0xff]  ;;  %738 = vmatprep.mubr.msk.f32.mxu1 %vm401_vm2, %v270_v6  ;;  %s269_s7 = scalar_lea.vmem %s1013_s3, %s703_s4  ;;  %s520_s10 = sadd.s32 (%p940_p6), %s851_s14, %s710_s9 }
  0x2e   : > { %s711_s11 = sshll.u32 (%p940_p6), %s520_s10, 3 }
  0x2f   : > { %s522_s24 = scalar_lea.vmem (%p940_p6), %s1012_s2, %s711_s11 }
  0x31   : > { %279 = vxpose.xlu0.b32.cont [2/4] (short) (narrow) %v271_v7, 8 }
  0x35   : > { %280 = vxpose.xlu0.b32.cont [3/4] (short) (narrow) %v272_v14, 8 }
  0x39   : > { %281 = vxpose.xlu0.b32.end [4/4] (short) (narrow) %v273_v15, 8 }
  0xad   : > { %v294_v16 = vpop.trf.xlu0 }
  0xae   : > { %734 = vmatmul.mubr.msk.f32.vlgmr.msra.gmra.mrb[0].mxu0 %vm310_vm1, %v294_v16 }
 0x181   : > { %v380_v17 = vpop.f32.mrb[0].mxu0 }
 0x182   : > { %v384_v18 = vrot.slane %v380_v17, 4  ;;  %v735_v19 = vpop.f32.mrb[1].mxu0 }
 0x184   : > { %v385_v20 = vmax.f32 %v380_v17, %v384_v18 }
 0x186   : > { %v386_v21 = vrot.slane %v385_v20, 2 }
 0x188   : > { %v387_v22 = vmax.f32 %v385_v20, %v386_v21 }
 0x18a   : > { %v388_v23 = vrot.slane %v387_v22, 1 }
 0x18c   : > { %v389_v24 = vmax.f32 %v387_v22, %v388_v23 }
 0x18e   : > { %v390_v25 = vsub.f32 %v380_v17, %v389_v24 }
 0x190   : > { %v391_v26 = vmul.f32 1.442695, %v390_v25 }
 0x192   : > { %809 = vpow2.f32 %v391_v26 }
 0x19c   : > { %v810_v27 = vpop.eup %809 }
 0x19d   : > { %v393_v28 = vrot.slane %v810_v27, 4 }
 0x19f   : > { %v394_v29 = vadd.f32 %v810_v27, %v393_v28 }
 0x1a1   : > { %v395_v30 = vrot.slane %v394_v29, 2 }
 0x1a3   : > { %v396_v31 = vadd.f32 %v395_v30, %v394_v29 }
 0x1a5   : > { %v397_v32 = vrot.slane %v396_v31, 1 }
 0x1a7   : > { %v398_v33 = vadd.f32 %v397_v32, %v396_v31 }
 0x1a9   : > { %811 = vrcp.f32 %v398_v33 }
 0x1b3   : > { %v812_v34 = vpop.eup %811 }
 0x1b4   : > { %v400_v35 = vmul.f32 %v812_v34, %v810_v27 }
 0x1b6   : > { %736 = vmatprep.subr.mxu1 %v400_v35  ;;  %503 = vst [vmem:[%s269_s7] sm:$0xff] %v400_v35 }
 0x1b7   : > { %737 = vmatpush3.msra.mxu1 %v400_v35 }
 0x1b8   : > { %739 = vmatmul.mubr.msk.f32.vlgmr.msra.gmra.mrb[0].mxu1 %vm401_vm2, %v271_v7 }
 0x1b9   : > { %741 = vmatprep.mubr.msk.f32.mxu1 %vm401_vm2, %v272_v14 }
 0x1bc   : > { %742 = vmatmul.mubr.msk.f32.gmra.mrb[2].mxu1 %vm401_vm2, %v273_v15 }
 0x28b   : > { %v740_v36 = vpop.f32.mrb[0].mxu1  ;;  %518 = sbr.rel (!%p940_p6) target bundleno = 666 (0x29a), region = 70 }
 0x28c   : > { %500 = vst [vmem:[%s246_s8 + $0x8] sm:$0xff] %v740_v36  ;;  %v480_v37 = vpop.f32.mrb[1].mxu1 }
 0x28d   : > { %499 = vst [vmem:[%s246_s8] sm:$0xff] %v480_v37 }
 0x28f   : > { %v743_v38 = vpop.f32.mrb[2].mxu1 }
 0x290   : > { %502 = vst [vmem:[%s246_s8 + $0x18] sm:$0xff] %v743_v38  ;;  %v490_v39 = vpop.f32.mrb[3].mxu1 }
 0x291   : > { %501 = vst [vmem:[%s246_s8 + $0x10] sm:$0xff] %v490_v39 }
 0x293   : > { %v558_v41 = vld [vmem:[%s246_s8 + $0x8] sm:$0xff] }
 0x294   : > { %v556_v40 = vld [vmem:[%s246_s8] sm:$0xff]  ;;  %559 = vst [vmem:[%s522_s24 + $0x10] sm:$0xff] %v558_v41 }
 0x295   : > { %557 = vst [vmem:[%s522_s24] sm:$0xff] %v556_v40 }
 0x297   : > { %v562_v43 = vld [vmem:[%s246_s8 + $0x18] sm:$0xff] }
 0x298   : > { %v560_v42 = vld [vmem:[%s246_s8 + $0x10] sm:$0xff]  ;;  %563 = vst [vmem:[%s522_s24 + $0x30] sm:$0xff] %v562_v43 }
 0x299   : > { %561 = vst [vmem:[%s522_s24 + $0x20] sm:$0xff] %v560_v42 }
 0x29a PF: > { %s14_s18 = sadd.s32 1, %s867_s18   ;;  %s1015_s12 = smov %s847_s13 }
 0x29b   : > { %p11_p0 = scmp.ge.s32.totalorder %s14_s18, 6   ;;  %s1016_s13 = smov %s948_s27 }
 0x29c   : > { %s1017_s14 = smov %s859_s16  ;;  %s1018_s15 = smov %s863_s17 }
 0x29d   : > { %s1019_s16 = smov %s1022_s19  ;;  %s1020_s17 = smov %s1026_s20 }
 0x29e   :  { %13 = sbr.rel (!%p11_p0) target bundleno = 4 (0x4), region = 154 }

</bundles_post_ra>
